<compile_context>
chip_gen: v7x
topology: tpu7x:2x2x1
jax: 0.10.0
libtpu: 0.0.40
codegen_flags: <defaults>
</compile_context>

<pallas_src>
import math
from math import ceil

import numpy as np
import jax
import jax.numpy as jnp
from jax.experimental import pallas as pl
from jax.experimental.pallas import tpu as pltpu

# ----------------------------------------------------------------------------
# Config (small synthetic shapes consistent with the module)
# ----------------------------------------------------------------------------
MODEL_CFG = dict(
    sparse_shape=(16, 16, 1),            # (xdim, ydim, zdim)
    window_shape=[[4, 4, 1]],            # per-stage base window
    downsample_stride=[],                # single stage
    d_model=[32],
    set_info=[[8, 4]],                   # [set_size, block_num]
    hybrid_factor=[2, 2, 1],
    shifts_list=[[[0, 0, 0], [2, 2, 0]]],
    normalize_pos=False,
)

_TM = 512  # row tile (multiple of 8 and 128); per-step overhead amortized, tiles fit VMEM easily


def _round_up(n, m):
    return ((n + m - 1) // m) * m


def _div_mod(v, w):
    """Integer divide / modulo with shift/mask fast path for power-of-two w."""
    w = int(w)
    if w == 1:
        return v, jnp.zeros_like(v)
    if (w & (w - 1)) == 0:
        k = w.bit_length() - 1
        return v >> k, v & (w - 1)
    return v // w, v % w


def _resolve_window_cfg(sparse_shape, window_shape, do_shift, shift_list):
    """Static per-(stage, shift) window-partition constants (mirrors get_window_coors)."""
    win_x, win_y, win_z = window_shape
    sx, sy, sz = sparse_shape
    mnw_x = int(math.ceil(sx / win_x)) + 1
    mnw_y = int(math.ceil(sy / win_y)) + 1
    mnw_z = int(math.ceil(sz / win_z)) + 1
    if shift_list is not None:
        shift_x, shift_y, shift_z = shift_list
    else:
        if do_shift:
            shift_x, shift_y, shift_z = win_x // 2, win_y // 2, win_z // 2
        else:
            shift_x, shift_y, shift_z = win_x, win_y, win_z
    if win_z == sz:   # 2D/3D window compatibility
        shift_z = 0
    return dict(win=(win_x, win_y, win_z),
                shift=(shift_x, shift_y, shift_z),
                mnw=(mnw_x, mnw_y, mnw_z))


# ----------------------------------------------------------------------------
# Pallas kernel 1: window partition, both shifts fused, lane-dense output
#   input  coors_T : (4, Np)  rows (batch, z, y, x)
#   output         : (8, Np)  rows (bwi_s0, z_s0, y_s0, x_s0, bwi_s1, z_s1, y_s1, x_s1)
# ----------------------------------------------------------------------------
def window_partition_both_shifts_pallas(coors_T, cfgs):
    Np = coors_T.shape[1]

    def kernel(ct_ref, out_ref):
        b = ct_ref[0:1, :]
        z = ct_ref[1:2, :]
        y = ct_ref[2:3, :]
        x = ct_ref[3:4, :]
        rows = []
        for cfg in cfgs:  # static python loop over the 2 shifts
            wx, wy, wz = cfg['win']
            sfx, sfy, sfz = cfg['shift']
            mx, my, mz = cfg['mnw']
            xs = x + sfx
            ys = y + sfy
            zs = z + sfz
            qx, rx = _div_mod(xs, wx)
            qy, ry = _div_mod(ys, wy)
            qz, rz = _div_mod(zs, wz)
            # TODO(synk): int32 window index; the reference uses int64 — verify
            # batch * mnw_per_sample < 2^31 for very large sparse shapes.
            bwi = b * (mx * my * mz) + qx * (my * mz) + qy * mz + qz
            rows += [bwi, rz, ry, rx]
        for k, row in enumerate(rows):
            out_ref[k:k + 1, :] = row

    return pl.pallas_call(
        kernel,
        out_shape=jax.ShapeDtypeStruct((8, Np), jnp.int32),
        grid=(Np // _TM,),
        in_specs=[pl.BlockSpec((4, _TM), lambda i: (0, i))],
        out_specs=pl.BlockSpec((8, _TM), lambda i: (0, i)),
        compiler_params=pltpu.CompilerParams(dimension_semantics=("parallel",)),
    )(coors_T)


# ----------------------------------------------------------------------------
# Pallas kernel 2: fused learned position embedding for ALL blocks of one shift
#   window math (shift + mod) + location build + Linear -> BN(eval) -> ReLU -> Linear
#   Second Linear uses a block-diagonal packed W2 -> one (TM,D)x(D,D) bf16 MXU matmul.
# ----------------------------------------------------------------------------
def pos_embed_fused_pallas(coors_p, params, cfg, pe_window_shape, normalize_pos):
    Np = coors_p.shape[0]
    D = params['b2s'].shape[1]
    wx, wy, wz = cfg['win']
    sfx, sfy, sfz = cfg['shift']

    # get_pos_embed window handling (matches reference)
    window_shape = pe_window_shape
    if len(window_shape) == 2:
        ndim = 2
        win_x_pe, win_y_pe = window_shape
        win_z_pe = 0
    elif window_shape[-1] == 1:
        ndim = 2
        win_x_pe, win_y_pe = window_shape[:2]
        win_z_pe = 0
    else:
        win_x_pe, win_y_pe, win_z_pe = window_shape
        ndim = 3

    def kernel(c_ref, w1_ref, b1_ref, s_ref, t_ref, w2_ref, b2_ref, out_ref):
        ci = c_ref[...]                      # (TM, 4) int32 rows (b, z, y, x)
        xs = ci[:, 3:4] + sfx
        ys = ci[:, 2:3] + sfy
        zs = ci[:, 1:2] + sfz
        _, rx = _div_mod(xs, wx)
        _, ry = _div_mod(ys, wy)
        _, rz = _div_mod(zs, wz)
        x = rx.astype(jnp.float32) - win_x_pe / 2.0
        y = ry.astype(jnp.float32) - win_y_pe / 2.0
        if ndim == 3:
            z = rz.astype(jnp.float32) - win_z_pe / 2.0
        if normalize_pos:
            x = x / win_x_pe * 2 * 3.1415
            y = y / win_y_pe * 2 * 3.1415
            if ndim == 3:                     # guard: avoids z / 0 for 2D windows
                z = z / win_z_pe * 2 * 3.1415
        # first Linear expanded as rank-1 broadcasts (K is tiny: 2 or 3)
        h = x * w1_ref[0:1, :] + y * w1_ref[1:2, :]
        if ndim == 3:
            h = h + z * w1_ref[2:3, :]
        h = h + b1_ref[...]
        # BatchNorm1d (eval mode) folded into affine scale/shift
        h = h * s_ref[...] + t_ref[...]
        h = jnp.maximum(h, 0.0)
        # block-diagonal second Linear for all blocks at once; bf16 MXU, f32 accumulate
        out_ref[...] = jnp.dot(h.astype(jnp.bfloat16), w2_ref[...],
                               preferred_element_type=jnp.float32) + b2_ref[...]

    return pl.pallas_call(
        kernel,
        out_shape=jax.ShapeDtypeStruct((Np, D), jnp.float32),
        grid=(Np // _TM,),
        in_specs=[
            pl.BlockSpec((_TM, 4), lambda i: (i, 0)),
            pl.BlockSpec((3, D), lambda i: (0, 0)),
            pl.BlockSpec((1, D), lambda i: (0, 0)),
            pl.BlockSpec((1, D), lambda i: (0, 0)),
            pl.BlockSpec((1, D), lambda i: (0, 0)),
            pl.BlockSpec((D, D), lambda i: (0, 0)),
            pl.BlockSpec((1, D), lambda i: (0, 0)),
        ],
        out_specs=pl.BlockSpec((_TM, D), lambda i: (i, 0)),
        compiler_params=pltpu.CompilerParams(dimension_semantics=("parallel",)),
    )(coors_p, params['W1s'], params['b1s'], params['bn_scale'], params['bn_shift'],
      params['W2bd'], params['b2s'])


# ----------------------------------------------------------------------------
# Host-side set partition (data-dependent output shapes; numpy glue)
# TODO(synk): torch.unique / bincount / sort / scatter with data-dependent set
#             counts have no static-shape Pallas equivalent; kept on host.
# ----------------------------------------------------------------------------
def _get_continous_inds_np(setnum_per_win):
    set_num = int(setnum_per_win.sum())
    cs = np.cumsum(setnum_per_win)[:-1]
    set_win_inds = np.zeros(set_num, dtype=np.int64)
    set_win_inds[cs] = 1
    set_win_inds = np.cumsum(set_win_inds)
    roll_left = np.roll(set_win_inds, -1)
    end_pos_mask = (set_win_inds - roll_left) != 0
    template = np.ones_like(set_win_inds)
    template[end_pos_mask] = (setnum_per_win - 1) * -1
    set_inds_in_win = np.cumsum(template)
    set_inds_in_win[end_pos_mask] = setnum_per_win
    set_inds_in_win = set_inds_in_win - 1
    return set_win_inds, set_inds_in_win


def _ingroup_inds_np(group_ids):
    """Vectorized replacement for the per-voxel Python loop: rank within group, original order."""
    group_ids = np.asarray(group_ids)
    n = group_ids.shape[0]
    if n == 0:
        return np.zeros_like(group_ids)
    order = np.argsort(group_ids, kind='stable')
    sorted_g = group_ids[order]
    new_run = np.empty(n, dtype=bool)
    new_run[0] = True
    new_run[1:] = sorted_g[1:] != sorted_g[:-1]
    run_starts = np.flatnonzero(new_run)
    run_ids = np.cumsum(new_run) - 1
    ranks = np.arange(n, dtype=np.int64) - run_starts[run_ids]
    out = np.empty_like(group_ids)
    out[order] = ranks.astype(group_ids.dtype)
    return out


def _get_set_single_shift_np(batch_win_inds, coors_in_win, window_shape, voxel_num_set):
    win_x, win_y, win_z = window_shape
    max_voxel = win_x * win_y * win_z
    _, contiguous_win_inds = np.unique(batch_win_inds, return_inverse=True)
    contiguous_win_inds = contiguous_win_inds.astype(np.int64)
    voxelnum_per_win = np.bincount(contiguous_win_inds)
    win_num = voxelnum_per_win.shape[0]
    setnum_per_win = np.ceil(voxelnum_per_win / voxel_num_set).astype(np.int64)
    set_win_inds, set_inds_in_win = _get_continous_inds_np(setnum_per_win)

    offset_idx = np.tile(set_inds_in_win[:, None], (1, voxel_num_set)) * voxel_num_set
    base_idx = np.arange(voxel_num_set, dtype=np.int64)
    base_select_idx = offset_idx + base_idx
    base_select_idx = base_select_idx * voxelnum_per_win[set_win_inds][:, None]
    base_select_idx = base_select_idx.astype(np.float64) / \
        (setnum_per_win[set_win_inds] * voxel_num_set)[:, None].astype(np.float64)
    base_select_idx = np.floor(base_select_idx)
    select_idx = (base_select_idx + set_win_inds[:, None] * max_voxel).astype(np.int64)

    inner_voxel_inds = _ingroup_inds_np(contiguous_win_inds)
    global_voxel_inds = contiguous_win_inds * max_voxel + inner_voxel_inds
    order1 = np.argsort(global_voxel_inds)

    def build(sort_key):
        order2 = np.argsort(sort_key)
        inner_sorted = -np.ones_like(inner_voxel_inds)
        inner_sorted[order2] = inner_voxel_inds[order1]
        voxel_inds_in_batch = inner_sorted + max_voxel * contiguous_win_inds
        padding = -np.ones(win_num * max_voxel, dtype=np.int64)
        padding[voxel_inds_in_batch] = np.arange(voxel_inds_in_batch.shape[0], dtype=np.int64)
        return padding[select_idx]

    key_sorty = (contiguous_win_inds * max_voxel
                 + coors_in_win[:, 1] * win_x * win_z
                 + coors_in_win[:, 2] * win_z
                 + coors_in_win[:, 0])
    key_sortx = (contiguous_win_inds * max_voxel
                 + coors_in_win[:, 2] * win_y * win_z
                 + coors_in_win[:, 1] * win_z
                 + coors_in_win[:, 0])
    return np.stack((build(key_sorty), build(key_sortx)), axis=0)


def _get_set_helper_np(batch_win_inds, coors_in_win, window_shape, voxel_num_set):
    set_voxel_inds = _get_set_single_shift_np(batch_win_inds, coors_in_win,
                                              window_shape, voxel_num_set)
    prefix = np.roll(set_voxel_inds, shift=1, axis=-1)
    prefix[:, :, 0] = -1
    set_voxel_mask = set_voxel_inds == prefix
    return set_voxel_inds, set_voxel_mask


# ----------------------------------------------------------------------------
# Parameter init (PositionEmbeddingLearned: Linear -> BN1d(eval) -> ReLU -> Linear)
# ----------------------------------------------------------------------------
def init_pos_embed_params(key, input_dim, d_model):
    k1, k2, k3, k4, k5, k6 = jax.random.split(key, 6)
    W1 = 0.1 * jax.random.normal(k1, (input_dim, d_model), jnp.float32)
    b1 = 0.1 * jax.random.normal(k2, (1, d_model), jnp.float32)
    gamma = 1.0 + 0.1 * jax.random.normal(k3, (1, d_model), jnp.float32)
    beta = 0.1 * jax.random.normal(k4, (1, d_model), jnp.float32)
    running_mean = jnp.zeros((1, d_model), jnp.float32)
    running_var = jnp.ones((1, d_model), jnp.float32)
    eps = 1e-5
    bn_scale = gamma / jnp.sqrt(running_var + eps)
    bn_shift = beta - running_mean * bn_scale
    W2 = 0.1 * jax.random.normal(k5, (d_model, d_model), jnp.float32)
    b2 = 0.1 * jax.random.normal(k6, (1, d_model), jnp.float32)
    return dict(W1=W1, b1=b1, bn_scale=bn_scale, bn_shift=bn_shift, W2=W2, b2=b2)


def _stack_block_params(block_params_list, input_dim, d_model):
    """Pack per-block MLP params for the fused pos-embed kernel (one shift)."""
    nb = len(block_params_list)
    D = nb * d_model
    W1s = jnp.zeros((3, D), jnp.float32)
    W2bd = jnp.zeros((D, D), jnp.float32)
    for b, p in enumerate(block_params_list):
        W1s = W1s.at[:input_dim, b * d_model:(b + 1) * d_model].set(p['W1'])
        W2bd = W2bd.at[b * d_model:(b + 1) * d_model,
                       b * d_model:(b + 1) * d_model].set(p['W2'])
    b1s = jnp.concatenate([p['b1'] for p in block_params_list], axis=1)
    bn_s = jnp.concatenate([p['bn_scale'] for p in block_params_list], axis=1)
    bn_t = jnp.concatenate([p['bn_shift'] for p in block_params_list], axis=1)
    b2s = jnp.concatenate([p['b2'] for p in block_params_list], axis=1)
    return dict(W1s=W1s, b1s=b1s, bn_scale=bn_s, bn_shift=bn_t,
                W2bd=W2bd.astype(jnp.bfloat16), b2s=b2s)


# ----------------------------------------------------------------------------
# DSVTInputLayer (JAX/Pallas)
# ----------------------------------------------------------------------------
class DSVTInputLayerPallas:
    def __init__(self, model_cfg, param_key):
        self.sparse_shape = model_cfg['sparse_shape']
        base_window = model_cfg['window_shape']
        self.downsample_stride = model_cfg['downsample_stride']
        self.d_model = model_cfg['d_model']
        self.set_info = model_cfg['set_info']
        self.stage_num = len(self.d_model)
        self.hybrid_factor = model_cfg['hybrid_factor']
        self.window_shape = [
            [base_window[s],
             [base_window[s][c] * self.hybrid_factor[c] for c in range(3)]]
            for s in range(self.stage_num)
        ]
        self.shift_list = model_cfg['shifts_list']
        self.normalize_pos = model_cfg['normalize_pos']
        self.num_shifts = [2] * len(self.window_shape)
        self.sparse_shape_list = [self.sparse_shape]
        for ds in self.downsample_stride:
            last = self.sparse_shape_list[-1]
            self.sparse_shape_list.append(
                (ceil(last[0] / ds[0]), ceil(last[1] / ds[1]), ceil(last[2] / ds[2])))

        # static window-partition constants per (stage, shift)
        self.win_cfgs = []
        for s in range(self.stage_num):
            self.win_cfgs.append([
                _resolve_window_cfg(self.sparse_shape_list[s], self.window_shape[s][i],
                                    i == 1, self.shift_list[s][i])
                for i in range(2)])

        # per-block params (mirrors module structure) + fused stacks per (stage, shift)
        self.posembed_params = []
        self.fused_pe_params = []
        for i in range(len(self.set_info)):
            input_dim = 3 if self.sparse_shape_list[i][-1] > 1 else 2
            stage_params = []
            for _ in range(self.set_info[i][1]):
                block_params = []
                for _ in range(self.num_shifts[i]):
                    param_key, sub = jax.random.split(param_key)
                    block_params.append(init_pos_embed_params(sub, input_dim, self.d_model[i]))
                stage_params.append(block_params)
            self.posembed_params.append(stage_params)

            per_shift = []
            for shift_id in range(self.num_shifts[i]):
                blocks = [stage_params[b][shift_id] for b in range(self.set_info[i][1])]
                per_shift.append(_stack_block_params(blocks, input_dim, self.d_model[i]))
            self.fused_pe_params.append(per_shift)

    def forward(self, voxel_feats, voxel_coors):
        voxel_info = {}
        voxel_info['voxel_feats_stage0'] = voxel_feats
        voxel_info['voxel_coors_stage0'] = voxel_coors.astype(jnp.int32)

        for stage_id in range(self.stage_num):
            coors = voxel_info[f'voxel_coors_stage{stage_id}']
            N = coors.shape[0]
            Np = _round_up(N, _TM)

            # --- hoisted padding / transpose (done once per stage) ---
            coors_p = jnp.pad(coors.astype(jnp.int32), ((0, Np - N), (0, 0)))  # (Np, 4)
            coors_T = coors_p.T                                                # (4, Np)
            cfgs = self.win_cfgs[stage_id]

            # --- window partition: both shifts in one Pallas call, lane-dense output ---
            win_out = window_partition_both_shifts_pallas(coors_T, cfgs)       # (8, Np)
            for i in range(2):
                voxel_info[f'batch_win_inds_stage{stage_id}_shift{i}'] = win_out[4 * i, :N]
                voxel_info[f'coors_in_win_stage{stage_id}_shift{i}'] = \
                    win_out[4 * i + 1:4 * i + 4, :N].T

            # --- learned position embeddings: one fused Pallas call per shift,
            #     dispatched BEFORE the host set-partition sync so device work
            #     overlaps host numpy bookkeeping ---
            nb = self.set_info[stage_id][1]
            d = self.d_model[stage_id]
            for shift_id in range(self.num_shifts[stage_id]):
                pe = pos_embed_fused_pallas(
                    coors_p, self.fused_pe_params[stage_id][shift_id],
                    cfgs[shift_id], self.window_shape[stage_id][shift_id],
                    self.normalize_pos)                                        # (Np, nb*d)
                for block_id in range(nb):
                    voxel_info[f'pos_embed_stage{stage_id}_block{block_id}_shift{shift_id}'] = \
                        pe[:N, block_id * d:(block_id + 1) * d]

            # --- set partition (host-side, data-dependent shapes) ---
            for shift_id in range(2):
                bwi_np = np.asarray(
                    voxel_info[f'batch_win_inds_stage{stage_id}_shift{shift_id}']).astype(np.int64)
                ciw_np = np.asarray(
                    voxel_info[f'coors_in_win_stage{stage_id}_shift{shift_id}']).astype(np.int64)
                inds, mask = _get_set_helper_np(
                    bwi_np, ciw_np, self.window_shape[stage_id][shift_id],
                    self.set_info[stage_id][0])
                voxel_info[f'set_voxel_inds_stage{stage_id}_shift{shift_id}'] = jnp.asarray(inds)
                voxel_info[f'set_voxel_mask_stage{stage_id}_shift{shift_id}'] = jnp.asarray(mask)

            if stage_id < self.stage_num - 1:
                # TODO(synk): subm_pooling (torch.unique/scatter pooling bookkeeping between
                # stages) not implemented; this synthetic config is single-stage.
                raise NotImplementedError("multi-stage pooling not implemented")
        return voxel_info


# ----------------------------------------------------------------------------
if __name__ == "__main__":
    key = jax.random.PRNGKey(0)
    B = 2
    n_per_batch = 32
    SX, SY, SZ = MODEL_CFG['sparse_shape']

    coors_list = []
    for b in range(B):
        kb = jax.random.fold_in(key, b)
        perm = jax.random.permutation(kb, SX * SY)[:n_per_batch]
        ys = (perm // SX).astype(jnp.int32)
        xs = (perm % SX).astype(jnp.int32)
        zs = jnp.zeros_like(xs)
        bs = jnp.full_like(xs, b)
        coors_list.append(jnp.stack([bs, zs, ys, xs], axis=1))
    voxel_coors = jnp.concatenate(coors_list, axis=0).astype(jnp.int32)     # (64, 4)
    voxel_feats = jax.random.normal(jax.random.fold_in(key, 100),
                                    (voxel_coors.shape[0], MODEL_CFG['d_model'][0]),
                                    jnp.float32)                            # (64, 32)

    layer = DSVTInputLayerPallas(MODEL_CFG, param_key=jax.random.fold_in(key, 999))
    voxel_info = layer.forward(voxel_feats, voxel_coors)

    for v in voxel_info.values():
        jax.block_until_ready(v)

    # light sanity checks
    assert voxel_info['pos_embed_stage0_block0_shift0'].shape == (64, 32)
    assert voxel_info['pos_embed_stage0_block3_shift1'].shape == (64, 32)
    assert voxel_info['coors_in_win_stage0_shift1'].shape == (64, 3)
    assert voxel_info['batch_win_inds_stage0_shift0'].shape == (64,)
    assert voxel_info['set_voxel_inds_stage0_shift0'].shape[0] == 2
    print("KERNEL_OK")
</pallas_src>

<mosaic_0001>
module attributes {stable_mosaic.version = 11 : i64} {
  func.func @kernel(%arg0: i32, %arg1: memref<4x512xi32, #tpu.memory_space<vmem>>, %arg2: memref<8x512xi32, #tpu.memory_space<vmem>>) attributes {dimension_semantics = [#tpu.dimension_semantics<parallel>], iteration_bounds = array<i64: 1>, scalar_prefetch = 0 : i64, scratch_operands = 0 : i64, tpu.core_type = #tpu.core_type<tc>, window_params = [{transform_indices = @transform_0, window_bounds = array<i64: 4, 512>}, {transform_indices = @transform_1, window_bounds = array<i64: 8, 512>}]} {
    %c0 = arith.constant 0 : index
    %c0_0 = arith.constant 0 : index
    %0 = vector.load %arg1[%c0, %c0_0] : memref<4x512xi32, #tpu.memory_space<vmem>>, vector<1x512xi32>
    %c1 = arith.constant 1 : index
    %c0_1 = arith.constant 0 : index
    %1 = vector.load %arg1[%c1, %c0_1] : memref<4x512xi32, #tpu.memory_space<vmem>>, vector<1x512xi32>
    %c2 = arith.constant 2 : index
    %c0_2 = arith.constant 0 : index
    %2 = vector.load %arg1[%c2, %c0_2] : memref<4x512xi32, #tpu.memory_space<vmem>>, vector<1x512xi32>
    %c3 = arith.constant 3 : index
    %c0_3 = arith.constant 0 : index
    %3 = vector.load %arg1[%c3, %c0_3] : memref<4x512xi32, #tpu.memory_space<vmem>>, vector<1x512xi32>
    %c0_i32 = arith.constant 0 : i32
    %4 = vector.broadcast %c0_i32 : i32 to vector<1x512xi32>
    %5 = arith.addi %3, %4 : vector<1x512xi32>
    %c0_i32_4 = arith.constant 0 : i32
    %6 = vector.broadcast %c0_i32_4 : i32 to vector<1x512xi32>
    %7 = arith.addi %2, %6 : vector<1x512xi32>
    %c0_i32_5 = arith.constant 0 : i32
    %8 = vector.broadcast %c0_i32_5 : i32 to vector<1x512xi32>
    %9 = arith.addi %1, %8 : vector<1x512xi32>
    %c2_i32 = arith.constant 2 : i32
    %10 = vector.broadcast %c2_i32 : i32 to vector<1x512xi32>
    %11 = arith.shrsi %5, %10 : vector<1x512xi32>
    %c3_i32 = arith.constant 3 : i32
    %12 = vector.broadcast %c3_i32 : i32 to vector<1x512xi32>
    %13 = arith.andi %5, %12 : vector<1x512xi32>
    %c2_i32_6 = arith.constant 2 : i32
    %14 = vector.broadcast %c2_i32_6 : i32 to vector<1x512xi32>
    %15 = arith.shrsi %7, %14 : vector<1x512xi32>
    %c3_i32_7 = arith.constant 3 : i32
    %16 = vector.broadcast %c3_i32_7 : i32 to vector<1x512xi32>
    %17 = arith.andi %7, %16 : vector<1x512xi32>
    %c0_i32_8 = arith.constant 0 : i32
    %18 = vector.broadcast %c0_i32_8 : i32 to vector<1x512xi32>
    %c50_i32 = arith.constant 50 : i32
    %19 = vector.broadcast %c50_i32 : i32 to vector<1x512xi32>
    %20 = arith.muli %0, %19 : vector<1x512xi32>
    %c10_i32 = arith.constant 10 : i32
    %21 = vector.broadcast %c10_i32 : i32 to vector<1x512xi32>
    %22 = arith.muli %11, %21 : vector<1x512xi32>
    %23 = arith.addi %20, %22 : vector<1x512xi32>
    %c2_i32_9 = arith.constant 2 : i32
    %24 = vector.broadcast %c2_i32_9 : i32 to vector<1x512xi32>
    %25 = arith.muli %15, %24 : vector<1x512xi32>
    %26 = arith.addi %23, %25 : vector<1x512xi32>
    %27 = arith.addi %26, %9 : vector<1x512xi32>
    %c2_i32_10 = arith.constant 2 : i32
    %28 = vector.broadcast %c2_i32_10 : i32 to vector<1x512xi32>
    %29 = arith.addi %3, %28 : vector<1x512xi32>
    %c2_i32_11 = arith.constant 2 : i32
    %30 = vector.broadcast %c2_i32_11 : i32 to vector<1x512xi32>
    %31 = arith.addi %2, %30 : vector<1x512xi32>
    %c0_i32_12 = arith.constant 0 : i32
    %32 = vector.broadcast %c0_i32_12 : i32 to vector<1x512xi32>
    %33 = arith.addi %1, %32 : vector<1x512xi32>
    %c3_i32_13 = arith.constant 3 : i32
    %34 = vector.broadcast %c3_i32_13 : i32 to vector<1x512xi32>
    %35 = arith.shrsi %29, %34 : vector<1x512xi32>
    %c7_i32 = arith.constant 7 : i32
    %36 = vector.broadcast %c7_i32 : i32 to vector<1x512xi32>
    %37 = arith.andi %29, %36 : vector<1x512xi32>
    %c3_i32_14 = arith.constant 3 : i32
    %38 = vector.broadcast %c3_i32_14 : i32 to vector<1x512xi32>
    %39 = arith.shrsi %31, %38 : vector<1x512xi32>
    %c7_i32_15 = arith.constant 7 : i32
    %40 = vector.broadcast %c7_i32_15 : i32 to vector<1x512xi32>
    %41 = arith.andi %31, %40 : vector<1x512xi32>
    %c0_i32_16 = arith.constant 0 : i32
    %42 = vector.broadcast %c0_i32_16 : i32 to vector<1x512xi32>
    %c18_i32 = arith.constant 18 : i32
    %43 = vector.broadcast %c18_i32 : i32 to vector<1x512xi32>
    %44 = arith.muli %0, %43 : vector<1x512xi32>
    %c6_i32 = arith.constant 6 : i32
    %45 = vector.broadcast %c6_i32 : i32 to vector<1x512xi32>
    %46 = arith.muli %35, %45 : vector<1x512xi32>
    %47 = arith.addi %44, %46 : vector<1x512xi32>
    %c2_i32_17 = arith.constant 2 : i32
    %48 = vector.broadcast %c2_i32_17 : i32 to vector<1x512xi32>
    %49 = arith.muli %39, %48 : vector<1x512xi32>
    %50 = arith.addi %47, %49 : vector<1x512xi32>
    %51 = arith.addi %50, %33 : vector<1x512xi32>
    %c0_18 = arith.constant 0 : index
    %c0_19 = arith.constant 0 : index
    %52 = vector.load %arg2[%c0_18, %c0_19] : memref<8x512xi32, #tpu.memory_space<vmem>>, vector<1x512xi32>
    tpu.vector_store %arg2[%c0_18, %c0_19], %27 {strides = array<i32>} : memref<8x512xi32, #tpu.memory_space<vmem>>, vector<1x512xi32>,
    %c1_20 = arith.constant 1 : index
    %c0_21 = arith.constant 0 : index
    %53 = vector.load %arg2[%c1_20, %c0_21] : memref<8x512xi32, #tpu.memory_space<vmem>>, vector<1x512xi32>
    tpu.vector_store %arg2[%c1_20, %c0_21], %18 {strides = array<i32>} : memref<8x512xi32, #tpu.memory_space<vmem>>, vector<1x512xi32>,
    %c2_22 = arith.constant 2 : index
    %c0_23 = arith.constant 0 : index
    %54 = vector.load %arg2[%c2_22, %c0_23] : memref<8x512xi32, #tpu.memory_space<vmem>>, vector<1x512xi32>
    tpu.vector_store %arg2[%c2_22, %c0_23], %17 {strides = array<i32>} : memref<8x512xi32, #tpu.memory_space<vmem>>, vector<1x512xi32>,
    %c3_24 = arith.constant 3 : index
    %c0_25 = arith.constant 0 : index
    %55 = vector.load %arg2[%c3_24, %c0_25] : memref<8x512xi32, #tpu.memory_space<vmem>>, vector<1x512xi32>
    tpu.vector_store %arg2[%c3_24, %c0_25], %13 {strides = array<i32>} : memref<8x512xi32, #tpu.memory_space<vmem>>, vector<1x512xi32>,
    %c4 = arith.constant 4 : index
    %c0_26 = arith.constant 0 : index
    %56 = vector.load %arg2[%c4, %c0_26] : memref<8x512xi32, #tpu.memory_space<vmem>>, vector<1x512xi32>
    tpu.vector_store %arg2[%c4, %c0_26], %51 {strides = array<i32>} : memref<8x512xi32, #tpu.memory_space<vmem>>, vector<1x512xi32>,
    %c5 = arith.constant 5 : index
    %c0_27 = arith.constant 0 : index
    %57 = vector.load %arg2[%c5, %c0_27] : memref<8x512xi32, #tpu.memory_space<vmem>>, vector<1x512xi32>
    tpu.vector_store %arg2[%c5, %c0_27], %42 {strides = array<i32>} : memref<8x512xi32, #tpu.memory_space<vmem>>, vector<1x512xi32>,
    %c6 = arith.constant 6 : index
    %c0_28 = arith.constant 0 : index
    %58 = vector.load %arg2[%c6, %c0_28] : memref<8x512xi32, #tpu.memory_space<vmem>>, vector<1x512xi32>
    tpu.vector_store %arg2[%c6, %c0_28], %41 {strides = array<i32>} : memref<8x512xi32, #tpu.memory_space<vmem>>, vector<1x512xi32>,
    %c7 = arith.constant 7 : index
    %c0_29 = arith.constant 0 : index
    %59 = vector.load %arg2[%c7, %c0_29] : memref<8x512xi32, #tpu.memory_space<vmem>>, vector<1x512xi32>
    tpu.vector_store %arg2[%c7, %c0_29], %37 {strides = array<i32>} : memref<8x512xi32, #tpu.memory_space<vmem>>, vector<1x512xi32>,
    return
  }
  func.func @transform_0(%arg0: i32) -> (i32, i32) {
    %c0_i32 = arith.constant 0 : i32
    %c0_i32_0 = arith.constant 0 : i32
    return %c0_i32, %arg0 : i32, i32
  }
  func.func @transform_1(%arg0: i32) -> (i32, i32) {
    %c0_i32 = arith.constant 0 : i32
    %c0_i32_0 = arith.constant 0 : i32
    return %c0_i32, %arg0 : i32, i32
  }
}

</mosaic_0001>

<bundles_post_ra>
// kernel: tpu_custom_call.1
= control target key start
LH: loop header
LB: loop body
LE: loop exit
PB: predicated region body
PF: predicated region fallthrough
CT: control target
= control target key end

     0   :  { %6 = vsyncpa [#allocation3], 0  ;;  %s200_s0 = inlined_call_operand.hbm [shape: s32[4,512], index: 0, kind: input, shape index: {}]   ;;  %s201_s1 = inlined_call_operand.hbm [shape: s32[8,512], index: 1, kind: output, shape index: {}]  }
   0x1   :  { %7 = vsyncpa [#allocation4], 0  ;;  %s143_s6 = smov [#allocation2]   ;;  %s95_s10 = scalar_lea.hbm %s200_s0, 256 }
   0x2   :  { %s14_s7 = sshll.u32 %s143_s6, 4  ;;  %p96_p0 = scmp.ne.s32.totalorder %s200_s0, %s95_s10  ;;  %s15_s7 = int_to_ptr.vmem [resolvable:$true] %s14_s7 }
   0x3   :  { %p99_p1 = scmp.lt.u32.totalorder %s95_s10, %s200_s0 }
   0x5   :  { %p101_p2 = pnand %p99_p1, %p96_p0 }
   0x7   :  { %104 = shalt.err (!%p101_p2)
}
   0x8   :  { %s105_s15 = scalar_lea.vmem %s15_s7, 256  ;;  %p110_p4 = scmp.lt.s32.totalorder %s15_s7, %s15_s7 }
   0x9   :  { %p106_p3 = scmp.ne.s32.totalorder %s15_s7, %s105_s15  ;;  %p111_p5 = scmp.lt.s32.totalorder %s105_s15, %s105_s15 }
   0xb   :  { %p112_p6 = por %p111_p5, %p110_p4 }
   0xd   :  { %p113_p7 = pnand %p112_p6, %p106_p3 }
   0xf   :  { %116 = shalt.err (!%p113_p7)
}
  0x10   :  { %17 = dma.hbm_to_vmem [thread:$0]  %s200_s0, 256, %s15_s7, [#allocation3]  }
  0x11   :  { %139 = dma.done.wait [#allocation3], 256  }
  0x12   :  { %140 = vsyncadd [#allocation3], 4294967040  ;;  %v50_v0 = vlaneseq  ;;  %v144_v2 = vmov 0   ;;  %v21_v3 = vld [vmem:[#allocation2] ss:$4 sm:$0xf] }
  0x13   :  { %v25_v4 = vld [vmem:[#allocation2 + $0x2] ss:$4 sm:$0xf]  ;;  %v27_v5 = vld [vmem:[#allocation2 + $0x3] ss:$4 sm:$0xf] }
  0x14   :  { %vm168_vm0 = vcmp.lt.s32.totalorder %v50_v0, 512  ;;  %v28_v6 = vshra.s32 %v27_v5, 2  ;;  %v30_v7 = vshra.s32 %v25_v4, 2  ;;  %v32_v8 = vmul.u32 50, %v21_v3  ;;  %s145_s0 = smov [#allocation5]  }
  0x15   :  { %57 = vst.msk [vmem:[#allocation5 + $0x1] ss:$8 sm:$0xf] %vm168_vm0, %v144_v2  ;;  %69 = vst.msk [vmem:[#allocation5 + $0x5] ss:$8 sm:$0xf] %vm168_vm0, %v144_v2 }
  0x16   :  { %v31_v9 = vand.u32 3, %v25_v4  ;;  %v29_v10 = vand.u32 3, %v27_v5  ;;  %v38_v11 = vadd.s32 2, %v27_v5  ;;  %v39_v12 = vadd.s32 2, %v25_v4  ;;  %s83_s18 = sshll.u32 %s145_s0, 4  ;;  %s84_s18 = int_to_ptr.vmem [resolvable:$true] %s83_s18 }
  0x17   :  { %v44_v13 = vmul.u32 18, %v21_v3  ;;  %v33_v14 = vmul.u32 10, %v28_v6  ;;  %v23_v21 = vld [vmem:[#allocation2 + $0x1] ss:$4 sm:$0xf]  ;;  %s117_s19 = scalar_lea.vmem %s84_s18, 512  ;;  %p122_p9 = scmp.lt.s32.totalorder %s84_s18, %s84_s18 }
  0x18   :  { %v35_v15 = vmul.u32 2, %v30_v7  ;;  %60 = vst.msk [vmem:[#allocation5 + $0x2] ss:$8 sm:$0xf] %vm168_vm0, %v31_v9  ;;  %v40_v16 = vshra.s32 %v38_v11, 3  ;;  %v42_v17 = vshra.s32 %v39_v12, 3  ;;  %p118_p8 = scmp.ne.s32.totalorder %s84_s18, %s117_s19  ;;  %p123_p10 = scmp.lt.s32.totalorder %s117_s19, %s117_s19 }
  0x19   :  { %63 = vst.msk [vmem:[#allocation5 + $0x3] ss:$8 sm:$0xf] %vm168_vm0, %v29_v10  ;;  %v43_v18 = vand.u32 7, %v39_v12  ;;  %v41_v19 = vand.u32 7, %v38_v11  ;;  %v34_v20 = vadd.s32 %v33_v14, %v32_v8 }
  0x1a   :  { %v45_v22 = vmul.u32 6, %v40_v16  ;;  %v47_v23 = vmul.u32 2, %v42_v17  ;;  %p124_p11 = por %p123_p10, %p122_p9 }
  0x1b   :  { %72 = vst.msk [vmem:[#allocation5 + $0x6] ss:$8 sm:$0xf] %vm168_vm0, %v43_v18  ;;  %75 = vst.msk [vmem:[#allocation5 + $0x7] ss:$8 sm:$0xf] %vm168_vm0, %v41_v19  ;;  %v36_v24 = vadd.s32 %v35_v15, %v34_v20 }
  0x1c   :  { %v46_v25 = vadd.s32 %v45_v22, %v44_v13  ;;  %p125_p12 = pnand %p124_p11, %p118_p8 }
  0x1d   :  { %v37_v26 = vadd.s32 %v36_v24, %v23_v21 }
  0x1e   :  { %v48_v27 = vadd.s32 %v47_v23, %v46_v25 }
  0x1f   :  { %54 = vst.msk [vmem:[#allocation5] ss:$8 sm:$0xf] %vm168_vm0, %v37_v26 }
  0x20   :  { %v49_v28 = vadd.s32 %v48_v27, %v23_v21 }
  0x22   :  { %66 = vst.msk [vmem:[#allocation5 + $0x4] ss:$8 sm:$0xf] %vm168_vm0, %v49_v28 }
  0x23   :  { %128 = shalt.err (!%p125_p12)
}
  0x24   :  { %s129_s22 = scalar_lea.hbm %s201_s1, 512 }
  0x25   :  { %p130_p13 = scmp.ne.s32.totalorder %s201_s1, %s129_s22  ;;  %p133_p0 = scmp.lt.u32.totalorder %s129_s22, %s201_s1 }
  0x27   :  { %p135_p1 = pnand %p133_p0, %p130_p13 }
  0x29   :  { %138 = shalt.err (!%p135_p1)
}
  0x2a   :  { %86 = dma.vmem_to_hbm [thread:$0]  %s84_s18, 512, %s201_s1, [#allocation4]  }
  0x2b   :  { %141 = dma.done.wait [#allocation4], 512  }
  0x2c   :  { %142 = vsyncadd [#allocation4], 4294966784 }
  0x2d   :  { %90 = vsyncpa [#allocation3], 1 }
  0x2e   :  { %91 = vsyncpa [#allocation4], 1 }

</bundles_post_ra>
